<compile_context>
chip_gen: v7x
topology: tpu7x:2x2x1
jax: 0.10.0
libtpu: 0.0.40
codegen_flags: <defaults>
</compile_context>

<pallas_src>
import functools
import math

import jax
import jax.numpy as jnp
from jax.experimental import pallas as pl
from jax.experimental.pallas import tpu as pltpu

ALPHA = 0.8
GAMMA = 2.0  # implemented as an explicit square below
LANES = 128
SUBLANES = 8


def _focal_loss_kernel(logits_ref, targets_ref, partial_ref):
    x = logits_ref[...].astype(jnp.float32)
    t = targets_ref[...].astype(jnp.float32)

    # probs = sigmoid(logits)
    p = jax.nn.sigmoid(x)

    # F.binary_cross_entropy(probs, targets, reduction='none'):
    #   PyTorch clamps each log term at -100.
    log_p_raw = jnp.log(p)
    log_p = jnp.maximum(log_p_raw, -100.0)

    # log(1 - sigmoid(x)) = log(sigmoid(x)) - x  (saves one EUP log per elem).
    # Clamp to [-100, 0]; log(1-p) is mathematically <= 0.
    log_1mp = jnp.minimum(jnp.maximum(log_p - x, -100.0), 0.0)
    # Match PyTorch semantics where p rounds to exactly 1.0 in f32:
    # there log(1-p) = log(0) = -inf -> clamped to -100.
    log_1mp = jnp.where(p >= 1.0, -100.0, log_1mp)

    bce = -(t * log_p + (1.0 - t) * log_1mp)

    # pt = p*t + (1-p)*(1-t);  focal_weight = alpha * (1 - pt)**2
    pt = p * t + (1.0 - p) * (1.0 - t)
    w = 1.0 - pt
    loss = (ALPHA * (w * w)) * bce

    # VPU-only partial reduction: (br, 128) -> (br//8, 8, 128) -> sum leading
    # axis (plain vreg adds, no cross-lane/XLU work).  One (8,128) partial
    # per grid step; the wrapper sums the partials.
    br = loss.shape[0]
    partial = jnp.sum(loss.reshape(br // SUBLANES, SUBLANES, LANES), axis=0)
    partial_ref[...] = partial.reshape(1, SUBLANES, LANES)


def _pick_block_rows(rows, target):
    """Largest multiple-of-8 divisor of `rows` not exceeding `target`."""
    if rows <= target:
        return rows
    br = target - (target % SUBLANES)
    while br >= SUBLANES:
        if rows % br == 0:
            return br
        br -= SUBLANES
    return rows  # unreachable when rows % 8 == 0


def focal_loss_mean(logits, targets, *, block_rows=4096):
    """Mean-reduced focal loss over all elements of `logits`/`targets`."""
    assert logits.shape == targets.shape
    total = math.prod(logits.shape)
    # TODO(synk): pad + mask to support totals not divisible by 8*128.
    assert total % (SUBLANES * LANES) == 0, "demo restricted to total % 1024 == 0"
    rows = total // LANES

    # Flatten row-major into a lane-dense (rows, 128) slab.  No dtype cast of
    # targets here: the cast happens inside the kernel (keeps HBM traffic at
    # the targets' natural width).
    lg = jnp.reshape(logits, (rows, LANES))
    tg = jnp.reshape(targets, (rows, LANES))

    br = _pick_block_rows(rows, block_rows)
    num_blocks = rows // br

    partials = pl.pallas_call(
        _focal_loss_kernel,
        out_shape=jax.ShapeDtypeStruct((num_blocks, SUBLANES, LANES), jnp.float32),
        grid_spec=pltpu.PrefetchScalarGridSpec(
            num_scalar_prefetch=0,
            grid=(num_blocks,),
            in_specs=[
                pl.BlockSpec((br, LANES), lambda i: (i, 0)),
                pl.BlockSpec((br, LANES), lambda i: (i, 0)),
            ],
            out_specs=pl.BlockSpec((1, SUBLANES, LANES), lambda i: (i, 0, 0)),
        ),
        compiler_params=pltpu.CompilerParams(
            # Each grid step writes its own output block -> fully parallel;
            # on v7x megacore this splits the work across both TensorCores.
            dimension_semantics=("parallel",),
        ),
    )(lg, tg)

    return jnp.sum(partials) / jnp.float32(total)


def _focal_loss_ref(logits, targets):
    """Pure-JAX reference matching the PyTorch module."""
    p = jax.nn.sigmoid(logits.astype(jnp.float32))
    t = targets.astype(jnp.float32)
    bce = -(t * jnp.maximum(jnp.log(p), -100.0)
            + (1.0 - t) * jnp.maximum(jnp.log(1.0 - p), -100.0))
    pt = p * t + (1.0 - p) * (1.0 - t)
    loss = ALPHA * (1.0 - pt) ** GAMMA * bce
    return jnp.mean(loss)


if __name__ == "__main__":
    key = jax.random.PRNGKey(0)
    k1, k2 = jax.random.split(key)
    # small NCHW-style shapes: batch=2, channels=4, spatial=16x16
    logits = jax.random.normal(k1, (2, 4, 16, 16), dtype=jnp.float32)
    targets = (jax.random.uniform(k2, (2, 4, 16, 16)) > 0.5).astype(jnp.float32)

    out = focal_loss_mean(logits, targets)
    out = jax.block_until_ready(out)

    ref = _focal_loss_ref(logits, targets)
    assert jnp.allclose(out, ref, rtol=1e-5, atol=1e-6), (out, ref)
    print("KERNEL_OK")
</pallas_src>

<mosaic_0001>
module attributes {stable_mosaic.version = 11 : i64} {
  func.func @_focal_loss_kernel(%arg0: i32, %arg1: memref<16x128xf32, #tpu.memory_space<vmem>>, %arg2: memref<16x128xf32, #tpu.memory_space<vmem>>, %arg3: memref<1x8x128xf32, #tpu.memory_space<vmem>>) attributes {dimension_semantics = [#tpu.dimension_semantics<parallel>], iteration_bounds = array<i64: 1>, scalar_prefetch = 0 : i64, scratch_operands = 0 : i64, tpu.core_type = #tpu.core_type<tc>, window_params = [{transform_indices = @transform_0, window_bounds = array<i64: 16, 128>}, {transform_indices = @transform_1, window_bounds = array<i64: 16, 128>}, {transform_indices = @transform_2, window_bounds = array<i64: 1, 8, 128>}]} {
    %c0 = arith.constant 0 : index
    %c0_0 = arith.constant 0 : index
    %0 = vector.load %arg1[%c0, %c0_0] : memref<16x128xf32, #tpu.memory_space<vmem>>, vector<16x128xf32>
    %c0_1 = arith.constant 0 : index
    %c0_2 = arith.constant 0 : index
    %1 = vector.load %arg2[%c0_1, %c0_2] : memref<16x128xf32, #tpu.memory_space<vmem>>, vector<16x128xf32>
    %2 = arith.negf %0 : vector<16x128xf32>
    %3 = math.exp %2 : vector<16x128xf32>
    %cst = arith.constant 1.000000e+00 : f32
    %4 = vector.broadcast %cst : f32 to vector<16x128xf32>
    %5 = arith.addf %4, %3 : vector<16x128xf32>
    %6 = arith.divf %4, %5 : vector<16x128xf32>
    %7 = math.log %6 : vector<16x128xf32>
    %cst_3 = arith.constant -1.000000e+02 : f32
    %8 = vector.broadcast %cst_3 : f32 to vector<16x128xf32>
    %9 = arith.maximumf %7, %8 : vector<16x128xf32>
    %10 = arith.subf %9, %0 : vector<16x128xf32>
    %cst_4 = arith.constant -1.000000e+02 : f32
    %11 = vector.broadcast %cst_4 : f32 to vector<16x128xf32>
    %12 = arith.maximumf %10, %11 : vector<16x128xf32>
    %cst_5 = arith.constant 0.000000e+00 : f32
    %13 = vector.broadcast %cst_5 : f32 to vector<16x128xf32>
    %14 = arith.minimumf %12, %13 : vector<16x128xf32>
    %cst_6 = arith.constant 1.000000e+00 : f32
    %15 = vector.broadcast %cst_6 : f32 to vector<16x128xf32>
    %16 = arith.cmpf oge, %6, %15 : vector<16x128xf32>
    %cst_7 = arith.constant -1.000000e+02 : f32
    %17 = vector.broadcast %cst_7 : f32 to vector<16x128xf32>
    %18 = arith.select %16, %17, %14 : vector<16x128xi1>, vector<16x128xf32>
    %19 = arith.mulf %1, %9 : vector<16x128xf32>
    %cst_8 = arith.constant 1.000000e+00 : f32
    %20 = vector.broadcast %cst_8 : f32 to vector<16x128xf32>
    %21 = arith.subf %20, %1 : vector<16x128xf32>
    %22 = arith.mulf %21, %18 : vector<16x128xf32>
    %23 = arith.addf %19, %22 : vector<16x128xf32>
    %cst_9 = arith.constant 0.000000e+00 : f32
    %24 = vector.broadcast %cst_9 : f32 to vector<16x128xf32>
    %25 = arith.subf %24, %23 : vector<16x128xf32>
    %26 = arith.mulf %6, %1 : vector<16x128xf32>
    %cst_10 = arith.constant 1.000000e+00 : f32
    %27 = vector.broadcast %cst_10 : f32 to vector<16x128xf32>
    %28 = arith.subf %27, %6 : vector<16x128xf32>
    %cst_11 = arith.constant 1.000000e+00 : f32
    %29 = vector.broadcast %cst_11 : f32 to vector<16x128xf32>
    %30 = arith.subf %29, %1 : vector<16x128xf32>
    %31 = arith.mulf %28, %30 : vector<16x128xf32>
    %32 = arith.addf %26, %31 : vector<16x128xf32>
    %cst_12 = arith.constant 1.000000e+00 : f32
    %33 = vector.broadcast %cst_12 : f32 to vector<16x128xf32>
    %34 = arith.subf %33, %32 : vector<16x128xf32>
    %35 = arith.mulf %34, %34 : vector<16x128xf32>
    %cst_13 = arith.constant 8.000000e-01 : f32
    %36 = vector.broadcast %cst_13 : f32 to vector<16x128xf32>
    %37 = arith.mulf %36, %35 : vector<16x128xf32>
    %38 = arith.mulf %37, %25 : vector<16x128xf32>
    %39 = vector.shape_cast %38 : vector<16x128xf32> to vector<2x8x128xf32>
    %cst_14 = arith.constant dense<0.000000e+00> : vector<8x128xf32>
    %40 = vector.multi_reduction <add>, %39, %cst_14 [0] : vector<2x8x128xf32> to vector<8x128xf32>
    %41 = vector.shape_cast %40 : vector<8x128xf32> to vector<1x8x128xf32>
    %c0_15 = arith.constant 0 : index
    %c0_16 = arith.constant 0 : index
    %c0_17 = arith.constant 0 : index
    %42 = vector.load %arg3[%c0_15, %c0_16, %c0_17] : memref<1x8x128xf32, #tpu.memory_space<vmem>>, vector<1x8x128xf32>
    tpu.vector_store %arg3[%c0_15, %c0_16, %c0_17], %41 {strides = array<i32>} : memref<1x8x128xf32, #tpu.memory_space<vmem>>, vector<1x8x128xf32>,
    return
  }
  func.func @transform_0(%arg0: i32) -> (i32, i32) {
    %c0_i32 = arith.constant 0 : i32
    %c0_i32_0 = arith.constant 0 : i32
    return %arg0, %c0_i32 : i32, i32
  }
  func.func @transform_1(%arg0: i32) -> (i32, i32) {
    %c0_i32 = arith.constant 0 : i32
    %c0_i32_0 = arith.constant 0 : i32
    return %arg0, %c0_i32 : i32, i32
  }
  func.func @transform_2(%arg0: i32) -> (i32, i32, i32) {
    %c0_i32 = arith.constant 0 : i32
    %c0_i32_0 = arith.constant 0 : i32
    %c0_i32_1 = arith.constant 0 : i32
    return %arg0, %c0_i32, %c0_i32_0 : i32, i32, i32
  }
}

</mosaic_0001>

<bundles_post_ra>
// kernel: tpu_custom_call.1
= control target key start
LH: loop header
LB: loop body
LE: loop exit
PB: predicated region body
PF: predicated region fallthrough
CT: control target
= control target key end

     0   :  { %7 = vsyncpa [#allocation3], 0  ;;  %s263_s0 = inlined_call_operand.hbm [shape: f32[16,128], index: 0, kind: input, shape index: {}]   ;;  %s264_s1 = inlined_call_operand.hbm [shape: f32[16,128], index: 1, kind: input, shape index: {}]   ;;  %s265_s2 = inlined_call_operand.hbm [shape: f32[1,8,128], index: 2, kind: output, shape index: {}]  }
   0x1   :  { %8 = vsyncpa [#allocation6], 0 }
   0x2   :  { %9 = vsyncpa [#allocation4], 0  ;;  %s207_s9 = smov [#allocation2]   ;;  %s135_s13 = scalar_lea.hbm %s263_s0, 256 }
   0x3   :  { %s15_s10 = sshll.u32 %s207_s9, 4  ;;  %p136_p0 = scmp.ne.s32.totalorder %s263_s0, %s135_s13  ;;  %s16_s10 = int_to_ptr.vmem [resolvable:$true] %s15_s10 }
   0x4   :  { %p139_p1 = scmp.lt.u32.totalorder %s135_s13, %s263_s0 }
   0x6   :  { %p141_p2 = pnand %p139_p1, %p136_p0 }
   0x8   :  { %144 = shalt.err (!%p141_p2)
}
   0x9   :  { %s145_s18 = scalar_lea.vmem %s16_s10, 256  ;;  %p150_p4 = scmp.lt.s32.totalorder %s16_s10, %s16_s10 }
   0xa   :  { %p146_p3 = scmp.ne.s32.totalorder %s16_s10, %s145_s18  ;;  %p151_p5 = scmp.lt.s32.totalorder %s145_s18, %s145_s18 }
   0xc   :  { %p152_p6 = por %p151_p5, %p150_p4 }
   0xe   :  { %p153_p7 = pnand %p152_p6, %p146_p3 }
  0x10   :  { %156 = shalt.err (!%p153_p7)
}
  0x11   :  { %s208_s19 = smov 128   ;;  %s209_s20 = smov 8  }
  0x12   :  { %21 = dma.hbm_to_vmem [thread:$0]  %s263_s0, 256, %s16_s10, [#allocation3], %s208_s19, %s208_s19, %s209_s20  }
  0x13   :  { %s210_s23 = smov [#allocation5]   ;;  %s157_s27 = scalar_lea.hbm %s264_s1, 256 }
  0x14   :  { %s27_s24 = sshll.u32 %s210_s23, 4  ;;  %p158_p8 = scmp.ne.s32.totalorder %s264_s1, %s157_s27  ;;  %s28_s24 = int_to_ptr.vmem [resolvable:$true] %s27_s24 }
  0x15   :  { %p161_p9 = scmp.lt.u32.totalorder %s157_s27, %s264_s1 }
  0x17   :  { %p163_p10 = pnand %p161_p9, %p158_p8 }
  0x19   :  { %166 = shalt.err (!%p163_p10)
}
  0x1a   :  { %s167_s4 = scalar_lea.vmem %s28_s24, 256  ;;  %p172_p12 = scmp.lt.s32.totalorder %s28_s24, %s28_s24 }
  0x1b   :  { %p168_p11 = scmp.ne.s32.totalorder %s28_s24, %s167_s4  ;;  %p173_p13 = scmp.lt.s32.totalorder %s167_s4, %s167_s4 }
  0x1d   :  { %p174_p0 = por %p173_p13, %p172_p12 }
  0x1f   :  { %p175_p1 = pnand %p174_p0, %p168_p11 }
  0x21   :  { %178 = shalt.err (!%p175_p1)
}
  0x22   :  { %33 = dma.hbm_to_vmem [thread:$0]  %s264_s1, 256, %s28_s24, [#allocation6], %s208_s19, %s208_s19, %s209_s20  }
  0x23   :  { %201 = dma.done.wait [#allocation3], 256  }
  0x24   :  { %202 = vsyncadd [#allocation3], 4294967040 }
  0x25   :  { %203 = dma.done.wait [#allocation6], 256  }
  0x26   :  { %204 = vsyncadd [#allocation6], 4294967040  ;;  %v40_v0 = vld [vmem:[#allocation2] sm:$0xff]  ;;  %v41_v1 = vld [vmem:[#allocation2 + $0x8] sm:$0xff]  ;;  %s211_s1 = smov [#allocation7]  }
  0x27   :  { %v116_v2 = vmul.f32 -1.442695, %v40_v0  ;;  %v117_v3 = vmul.f32 -1.442695, %v41_v1  ;;  %v42_v10 = vld [vmem:[#allocation5] sm:$0xff]  ;;  %v43_v11 = vld [vmem:[#allocation5 + $0x8] sm:$0xff] }
  0x28   :  { %v74_v12 = vsub.f32 1.0, %v42_v10  ;;  %v75_v14 = vsub.f32 1.0, %v43_v11  ;;  %s106_s6 = sshll.u32 %s211_s1, 4  ;;  %s107_s6 = int_to_ptr.vmem [resolvable:$true] %s106_s6 }
  0x29   :  { %123 = vpow2.f32 %v116_v2  ;;  %s179_s7 = scalar_lea.vmem %s107_s6, 128  ;;  %p184_p3 = scmp.lt.s32.totalorder %s107_s6, %s107_s6 }
  0x2a   :  { %125 = vpow2.f32 %v117_v3  ;;  %p180_p2 = scmp.ne.s32.totalorder %s107_s6, %s179_s7  ;;  %p185_p4 = scmp.lt.s32.totalorder %s179_s7, %s179_s7 }
  0x2c   :  { %p186_p5 = por %p185_p4, %p184_p3 }
  0x2e   :  { %p187_p6 = pnand %p186_p5, %p180_p2 }
  0x33   :  { %v124_v4 = vpop.eup %123 }
  0x34   :  { %v126_v5 = vpop.eup %125  ;;  %v50_v6 = vadd.f32 1.0, %v124_v4 }
  0x35   :  { %v51_v7 = vadd.f32 1.0, %v126_v5 }
  0x36   :  { %127 = vrcp.f32 %v50_v6 }
  0x37   :  { %129 = vrcp.f32 %v51_v7 }
  0x40   :  { %v128_v8 = vpop.eup %127 }
  0x41   :  { %v130_v9 = vpop.eup %129  ;;  %131 = vlog2.f32 %v128_v8  ;;  %v84_v13 = vsub.f32 1.0, %v128_v8  ;;  %v82_v16 = vmul.f32 %v128_v8, %v42_v10  ;;  %vm68_vm0 = vcmp.ge.f32.partialorder %v128_v8, 1.0 }
  0x42   :  { %133 = vlog2.f32 %v130_v9  ;;  %v85_v15 = vsub.f32 1.0, %v130_v9  ;;  %v83_v18 = vmul.f32 %v130_v9, %v43_v11  ;;  %vm69_vm1 = vcmp.ge.f32.partialorder %v130_v9, 1.0 }
  0x43   :  { %v86_v17 = vmul.f32 %v84_v13, %v74_v12 }
  0x44   :  { %v87_v19 = vmul.f32 %v85_v15, %v75_v14 }
  0x45   :  { %v88_v24 = vadd.f32 %v86_v17, %v82_v16 }
  0x46   :  { %v89_v26 = vadd.f32 %v87_v19, %v83_v18 }
  0x47   :  { %v90_v30 = vsub.f32 1.0, %v88_v24 }
  0x48   :  { %v91_v32 = vsub.f32 1.0, %v89_v26 }
  0x49   :  { %v92_v37 = vmul.f32 %v90_v30, %v90_v30 }
  0x4a   :  { %v93_v40 = vmul.f32 %v91_v32, %v91_v32 }
  0x4b   :  { %v132_v20 = vpop.eup %131  ;;  %v94_v45 = vmul.f32 0.8, %v92_v37 }
  0x4c   :  { %v134_v21 = vpop.eup %133  ;;  %v57_v22 = vmul.f32 0.6931472, %v132_v20  ;;  %v95_v47 = vmul.f32 0.8, %v93_v40 }
  0x4d   :  { %v59_v23 = vmul.f32 0.6931472, %v134_v21 }
  0x4e   :  { %v60_v25 = vmax.f32 %v57_v22, -100.0 }
  0x4f   :  { %v61_v27 = vmax.f32 %v59_v23, -100.0 }
  0x50   :  { %v62_v28 = vsub.f32 %v60_v25, %v40_v0  ;;  %v72_v36 = vmul.f32 %v60_v25, %v42_v10 }
  0x51   :  { %v63_v29 = vsub.f32 %v61_v27, %v41_v1  ;;  %v73_v39 = vmul.f32 %v61_v27, %v43_v11 }
  0x52   :  { %v64_v31 = vmax.f32 %v62_v28, -100.0 }
  0x53   :  { %v65_v33 = vmax.f32 %v63_v29, -100.0 }
  0x54   :  { %v66_v34 = vmin.f32 %v64_v31, 0.0 }
  0x55   :  { %v67_v35 = vmin.f32 %v65_v33, 0.0 }
  0x56   :  { %v70_v38 = vsel %vm68_vm0, -100.0, %v66_v34 }
  0x57   :  { %v71_v41 = vsel %vm69_vm1, -100.0, %v67_v35  ;;  %v76_v42 = vmul.f32 %v74_v12, %v70_v38 }
  0x58   :  { %v77_v43 = vmul.f32 %v75_v14, %v71_v41 }
  0x59   :  { %v78_v44 = vadd.f32 %v76_v42, %v72_v36 }
  0x5a   :  { %v79_v46 = vadd.f32 %v77_v43, %v73_v39 }
  0x5b   :  { %v80_v48 = vsub.f32 0.0, %v78_v44 }
  0x5c   :  { %v81_v49 = vsub.f32 0.0, %v79_v46 }
  0x5d   :  { %v96_v50 = vmul.f32 %v94_v45, %v80_v48 }
  0x5e   :  { %v97_v51 = vmul.f32 %v95_v47, %v81_v49 }
  0x60   :  { %v98_v52 = vadd.f32 %v97_v51, %v96_v50 }
  0x62   :  { %99 = vst [vmem:[#allocation7] sm:$0xff] %v98_v52 }
  0x63   :  { %190 = shalt.err (!%p187_p6)
}
  0x64   :  { %s191_s10 = scalar_lea.hbm %s265_s2, 128 }
  0x65   :  { %p192_p7 = scmp.ne.s32.totalorder %s265_s2, %s191_s10  ;;  %p195_p8 = scmp.lt.u32.totalorder %s191_s10, %s265_s2 }
  0x67   :  { %p197_p9 = pnand %p195_p8, %p192_p7 }
  0x69   :  { %200 = shalt.err (!%p197_p9)
}
  0x6a   :  { %109 = dma.vmem_to_hbm [thread:$0]  %s107_s6, 128, %s265_s2, [#allocation4]  }
  0x6b   :  { %205 = dma.done.wait [#allocation4], 128  }
  0x6c   :  { %206 = vsyncadd [#allocation4], 4294967168 }
  0x6d   :  { %113 = vsyncpa [#allocation3], 1 }
  0x6e   :  { %114 = vsyncpa [#allocation6], 1 }
  0x6f   :  { %115 = vsyncpa [#allocation4], 1 }

</bundles_post_ra>
